<compile_context>
chip_gen: v5e
topology: v5e:2x2
jax: 0.10.0
libtpu: 0.0.40
codegen_flags: <defaults>
</compile_context>

<pallas_src>
import jax
import jax.numpy as jnp
from jax.experimental import pallas as pl
from jax.experimental.pallas import tpu as pltpu


def _round_up(v, m):
    return ((v + m - 1) // m) * m


# ---------------------------------------------------------------------------
# Kernel: fused encoder + decoder for one batch tile
# ---------------------------------------------------------------------------
def autoencoder_kernel(
    x_ref, c_ref,
    w1x_ref, w1c_ref, b1_ref,      # encoder layer 1 (split for x / c)
    w23_ref, w3c_ref, b23_ref,     # fused (enc layer 2) @ (dec layer 1) + c path
    w4_ref, b4_ref,                # decoder layer 2
    out_ref,
):
    x = x_ref[...]
    c = c_ref[...]

    # encoder layer 1: Linear(input_dim + condition_dim -> hidden_dim) + ReLU
    h1 = (
        jnp.dot(x, w1x_ref[...], preferred_element_type=jnp.float32)
        + jnp.dot(c, w1c_ref[...], preferred_element_type=jnp.float32)
        + b1_ref[...]
    )
    h1 = jnp.maximum(h1, 0.0)

    # fused: h2 = ReLU(enc @ W3e + c @ W3c + b3)
    #            = ReLU(h1 @ (W2 @ W3e) + c @ W3c + (b2 @ W3e + b3))
    h2 = (
        jnp.dot(h1.astype(w23_ref.dtype), w23_ref[...],
                preferred_element_type=jnp.float32)
        + jnp.dot(c, w3c_ref[...], preferred_element_type=jnp.float32)
        + b23_ref[...]
    )
    h2 = jnp.maximum(h2, 0.0)

    # decoder layer 2: Linear(hidden_dim -> input_dim)
    out = (
        jnp.dot(h2.astype(w4_ref.dtype), w4_ref[...],
                preferred_element_type=jnp.float32)
        + b4_ref[...]
    )
    out_ref[...] = out.astype(out_ref.dtype)


# ---------------------------------------------------------------------------
# Hardware / tiling helpers
# ---------------------------------------------------------------------------
def _tpu_info():
    """Best-effort (num_tensorcores_sharing_grid, physical_vmem_bytes)."""
    num_tc, vmem_cap = 1, 64 << 20          # conservative fallback
    try:
        vmem_cap = int(pltpu.get_tpu_info().vmem_capacity_bytes)
    except Exception:
        pass
    try:
        kind = jax.devices()[0].device_kind.lower()
        if "v7" in kind or "v4" in kind:    # chips with 2 TCs behind one device
            num_tc = 2
    except Exception:
        pass
    return num_tc, vmem_cap


def _padded_2d_bytes(shape, dtype):
    """VMEM bytes of a 2-D array after (sublane, lane) layout padding."""
    itemsize = jnp.dtype(dtype).itemsize
    sub, lane = shape
    sub_mult = 8 if itemsize >= 4 else (16 if itemsize == 2 else 32)
    return _round_up(sub, sub_mult) * _round_up(lane, 128) * itemsize


def _estimate_vmem_bytes(tb, input_dim, condition_dim, hidden_dim, io_dtype, weights):
    io_item = jnp.dtype(io_dtype).itemsize
    lane = lambda n: _round_up(n, 128)
    # double-buffered streaming tiles: x, c, out (lane-padded)
    stream = 2 * tb * (2 * lane(input_dim) + lane(condition_dim)) * io_item
    # in-kernel f32 intermediates h1, h2 (lane-padded)
    interm = 2 * tb * lane(hidden_dim) * 4
    # resident (still double-buffered) weights / biases
    wbytes = sum(_padded_2d_bytes(w.shape, w.dtype) for w in weights)
    return stream + interm + 2 * wbytes + (6 << 20)   # + compiler scratch headroom


def _select_batch_tile(B, batch_tile, num_tc, vmem_budget, vmem_fn):
    tb = min(batch_tile, B)
    # On 2-TC chips make sure the "parallel" axis has >= num_tc grid steps.
    if num_tc >= 2 and B > 256:
        tb = min(tb, _round_up(pl.cdiv(B, num_tc), 8))
    if tb < B:
        tb = _round_up(tb, 8)
    # Shrink until the padded footprint fits the VMEM budget.
    while vmem_fn(tb) > vmem_budget and tb > 512:
        tb = max(_round_up(tb // 2, 8), 8)
    if tb >= B:
        return B
    # Balance both TensorCores: make the number of grid steps a multiple of
    # num_tc (avoids e.g. a 2:1 imbalance with 3 steps on a 2-TC chip).
    n = pl.cdiv(B, tb)
    if num_tc >= 2 and n > 1 and n % num_tc:
        tb = _round_up(pl.cdiv(B, _round_up(n, num_tc)), 8)
    return tb


def _prepare_kernel_params(raw_params, input_dim, encoding_dim, dtype):
    """Split the concat-matmuls and fuse the encoding layer (in f32), then cast."""
    w1, b1, w2, b2, w3, b3, w4, b4 = raw_params
    w1x, w1c = w1[:input_dim], w1[input_dim:]
    w3e, w3c = w3[:encoding_dim], w3[encoding_dim:]
    w23 = w2 @ w3e                 # (hidden, hidden) — exact algebraic fusion
    b23 = b2 @ w3e + b3            # (1, hidden)
    ws = (w1x, w1c, b1, w23, w3c, b23, w4, b4)
    return tuple(w.astype(dtype) for w in ws)


# ---------------------------------------------------------------------------
# Wrapper
# ---------------------------------------------------------------------------
def autoencoder_forward(x, c, raw_params, *, batch_tile=None, io_dtype=None,
                        num_cores=None):
    """Fused forward pass.

    raw_params: (w1, b1, w2, b2, w3, b3, w4, b4) with weights (in, out).
    batch_tile: rows per grid step; default 8192 (f32 I/O) / 16384 (bf16 I/O).
    io_dtype:   optional narrower dtype (e.g. jnp.bfloat16) for x/c/out AND the
                weights — native bf16 MXU, f32 accumulation.
    num_cores:  override TensorCore count (testing / forcing a grid split).
    """
    B, input_dim = x.shape
    Bc, condition_dim = c.shape
    assert B == Bc, "x and c must share the batch dimension"
    hidden_dim = raw_params[0].shape[1]
    encoding_dim = raw_params[2].shape[1]

    num_tc, vmem_cap = _tpu_info()
    if num_cores is not None:
        num_tc = num_cores
    vmem_budget = int(0.8 * vmem_cap)        # leave headroom for compiler scratch

    compute_dtype = io_dtype if io_dtype is not None else x.dtype
    if io_dtype is not None:
        x = x.astype(io_dtype)
        c = c.astype(io_dtype)
    weights = _prepare_kernel_params(raw_params, input_dim, encoding_dim,
                                     compute_dtype)

    if batch_tile is None:
        batch_tile = 16384 if jnp.dtype(x.dtype).itemsize <= 2 else 8192

    vmem_fn = lambda tb: _estimate_vmem_bytes(
        tb, input_dim, condition_dim, hidden_dim, x.dtype, weights)
    tb = _select_batch_tile(B, batch_tile, num_tc, vmem_budget, vmem_fn)
    grid = (pl.cdiv(B, tb),)
    vmem_limit = int(min(max(vmem_fn(tb), 32 << 20), vmem_budget))

    def batch_spec(feat):
        return pl.BlockSpec((tb, feat), lambda i: (i, 0))

    def full_spec(shape):
        return pl.BlockSpec(shape, lambda i: (0,) * len(shape))

    return pl.pallas_call(
        autoencoder_kernel,
        out_shape=jax.ShapeDtypeStruct((B, input_dim), x.dtype),
        grid_spec=pltpu.PrefetchScalarGridSpec(
            num_scalar_prefetch=0,
            grid=grid,
            in_specs=[batch_spec(input_dim), batch_spec(condition_dim)]
            + [full_spec(w.shape) for w in weights],
            out_specs=batch_spec(input_dim),
        ),
        compiler_params=pltpu.CompilerParams(
            dimension_semantics=("parallel",),
            vmem_limit_bytes=vmem_limit,
        ),
    )(x, c, *weights)


# ---------------------------------------------------------------------------
# Deterministic parameter init (mirrors nn.Linear default: U(-k, k), k=1/sqrt(fan_in))
# ---------------------------------------------------------------------------
def init_params(key, input_dim, condition_dim, encoding_dim, hidden_dim):
    def linear(key, fan_in, fan_out):
        kw, kb = jax.random.split(key)
        k = 1.0 / jnp.sqrt(fan_in)
        w = jax.random.uniform(kw, (fan_in, fan_out), jnp.float32, -k, k)
        b = jax.random.uniform(kb, (1, fan_out), jnp.float32, -k, k)
        return w, b

    k1, k2, k3, k4 = jax.random.split(key, 4)
    w1, b1 = linear(k1, input_dim + condition_dim, hidden_dim)
    w2, b2 = linear(k2, hidden_dim, encoding_dim)
    w3, b3 = linear(k3, encoding_dim + condition_dim, hidden_dim)
    w4, b4 = linear(k4, hidden_dim, input_dim)
    return (w1, b1, w2, b2, w3, b3, w4, b4)


def reference_forward(x, c, raw_params):
    """Pure-JAX reference matching the PyTorch forward (concat semantics)."""
    w1, b1, w2, b2, w3, b3, w4, b4 = raw_params
    xc = jnp.concatenate([x, c], axis=1)
    h1 = jnp.maximum(xc @ w1 + b1, 0.0)
    enc = h1 @ w2 + b2
    ec = jnp.concatenate([enc, c], axis=1)
    h2 = jnp.maximum(ec @ w3 + b3, 0.0)
    return h2 @ w4 + b4


if __name__ == "__main__":
    INPUT_DIM, CONDITION_DIM, ENCODING_DIM, HIDDEN_DIM = 48, 15, 2, 8

    key = jax.random.PRNGKey(0)
    kp, kx, kc = jax.random.split(key, 3)
    params = init_params(kp, INPUT_DIM, CONDITION_DIM, ENCODING_DIM, HIDDEN_DIM)

    # ---- small-shape check (single tile) -------------------------------------
    B0 = 8
    x0 = jax.random.normal(kx, (B0, INPUT_DIM), jnp.float32)
    c0 = jax.random.normal(kc, (B0, CONDITION_DIM), jnp.float32)
    out0 = jax.block_until_ready(autoencoder_forward(x0, c0, params))
    ref0 = reference_forward(x0, c0, params)
    assert out0.shape == (B0, INPUT_DIM)
    assert jnp.allclose(out0, ref0, atol=1e-4, rtol=1e-4), \
        "mismatch vs JAX reference (B=8)"

    # ---- multi-tile check: partial last tile ---------------------------------
    B1 = 2080  # with batch_tile=1024: grid = 3, last tile partially filled
    x1 = jax.random.normal(kx, (B1, INPUT_DIM), jnp.float32)
    c1 = jax.random.normal(kc, (B1, CONDITION_DIM), jnp.float32)
    ref1 = reference_forward(x1, c1, params)
    out1 = jax.block_until_ready(
        autoencoder_forward(x1, c1, params, batch_tile=1024))
    assert out1.shape == (B1, INPUT_DIM)
    assert jnp.allclose(out1, ref1, atol=1e-4, rtol=1e-4), \
        "mismatch vs JAX reference (B=2080, multi-tile)"

    # ---- forced 2-TensorCore split path (even grid, balanced tiles) ----------
    out2 = jax.block_until_ready(
        autoencoder_forward(x1, c1, params, num_cores=2))
    assert jnp.allclose(out2, ref1, atol=1e-4, rtol=1e-4), \
        "mismatch vs JAX reference (B=2080, forced 2-way split)"

    # ---- bf16-I/O + bf16-weights path (native bf16 MXU, f32 accumulation) ----
    out_bf16 = jax.block_until_ready(
        autoencoder_forward(x1, c1, params, io_dtype=jnp.bfloat16))
    assert out_bf16.dtype == jnp.bfloat16
    assert jnp.allclose(out_bf16.astype(jnp.float32), ref1, atol=0.2, rtol=0.1), \
        "bf16 path mismatch vs f32 reference"

    print("KERNEL_OK")
</pallas_src>

<mosaic_0001>
module attributes {stable_mosaic.version = 11 : i64} {
  func.func @autoencoder_kernel(%arg0: i32, %arg1: memref<8x48xf32, #tpu.memory_space<vmem>>, %arg2: memref<8x15xf32, #tpu.memory_space<vmem>>, %arg3: memref<48x8xf32, #tpu.memory_space<vmem>>, %arg4: memref<15x8xf32, #tpu.memory_space<vmem>>, %arg5: memref<1x8xf32, #tpu.memory_space<vmem>>, %arg6: memref<8x8xf32, #tpu.memory_space<vmem>>, %arg7: memref<15x8xf32, #tpu.memory_space<vmem>>, %arg8: memref<1x8xf32, #tpu.memory_space<vmem>>, %arg9: memref<8x48xf32, #tpu.memory_space<vmem>>, %arg10: memref<1x48xf32, #tpu.memory_space<vmem>>, %arg11: memref<8x48xf32, #tpu.memory_space<vmem>>) attributes {dimension_semantics = [#tpu.dimension_semantics<parallel>], iteration_bounds = array<i64: 1>, scalar_prefetch = 0 : i64, scratch_operands = 0 : i64, tpu.core_type = #tpu.core_type<tc>, window_params = [{transform_indices = @transform_0, window_bounds = array<i64: 8, 48>}, {transform_indices = @transform_1, window_bounds = array<i64: 8, 15>}, {pipeline_mode = #tpu.pipeline_mode<synchronous>, transform_indices = @transform_2, window_bounds = array<i64: 48, 8>}, {pipeline_mode = #tpu.pipeline_mode<synchronous>, transform_indices = @transform_3, window_bounds = array<i64: 15, 8>}, {pipeline_mode = #tpu.pipeline_mode<synchronous>, transform_indices = @transform_4, window_bounds = array<i64: 1, 8>}, {pipeline_mode = #tpu.pipeline_mode<synchronous>, transform_indices = @transform_5, window_bounds = array<i64: 8, 8>}, {pipeline_mode = #tpu.pipeline_mode<synchronous>, transform_indices = @transform_6, window_bounds = array<i64: 15, 8>}, {pipeline_mode = #tpu.pipeline_mode<synchronous>, transform_indices = @transform_7, window_bounds = array<i64: 1, 8>}, {pipeline_mode = #tpu.pipeline_mode<synchronous>, transform_indices = @transform_8, window_bounds = array<i64: 8, 48>}, {pipeline_mode = #tpu.pipeline_mode<synchronous>, transform_indices = @transform_9, window_bounds = array<i64: 1, 48>}, {transform_indices = @transform_10, window_bounds = array<i64: 8, 48>}]} {
    %c0 = arith.constant 0 : index
    %c0_0 = arith.constant 0 : index
    %0 = vector.load %arg1[%c0, %c0_0] : memref<8x48xf32, #tpu.memory_space<vmem>>, vector<8x48xf32>
    %c0_1 = arith.constant 0 : index
    %c0_2 = arith.constant 0 : index
    %1 = vector.load %arg2[%c0_1, %c0_2] : memref<8x15xf32, #tpu.memory_space<vmem>>, vector<8x15xf32>
    %c0_3 = arith.constant 0 : index
    %c0_4 = arith.constant 0 : index
    %2 = vector.load %arg3[%c0_3, %c0_4] : memref<48x8xf32, #tpu.memory_space<vmem>>, vector<48x8xf32>
    %cst = arith.constant dense<0.000000e+00> : vector<8x8xf32>
    %3 = tpu.matmul %0, %2, %cst {dimension_numbers = #tpu.dot_dimension_numbers<[1], [0], [0], [1], [0, 0, 1, 1], [], []>} : vector<8x48xf32>, vector<48x8xf32>, vector<8x8xf32> -> vector<8x8xf32>
    %c0_5 = arith.constant 0 : index
    %c0_6 = arith.constant 0 : index
    %4 = vector.load %arg4[%c0_5, %c0_6] : memref<15x8xf32, #tpu.memory_space<vmem>>, vector<15x8xf32>
    %cst_7 = arith.constant dense<0.000000e+00> : vector<8x8xf32>
    %5 = tpu.matmul %1, %4, %cst_7 {dimension_numbers = #tpu.dot_dimension_numbers<[1], [0], [0], [1], [0, 0, 1, 1], [], []>} : vector<8x15xf32>, vector<15x8xf32>, vector<8x8xf32> -> vector<8x8xf32>
    %6 = arith.addf %3, %5 : vector<8x8xf32>
    %c0_8 = arith.constant 0 : index
    %c0_9 = arith.constant 0 : index
    %7 = vector.load %arg5[%c0_8, %c0_9] : memref<1x8xf32, #tpu.memory_space<vmem>>, vector<1x8xf32>
    %8 = vector.broadcast %7 : vector<1x8xf32> to vector<8x8xf32>
    %9 = arith.addf %6, %8 : vector<8x8xf32>
    %cst_10 = arith.constant 0.000000e+00 : f32
    %10 = vector.broadcast %cst_10 : f32 to vector<8x8xf32>
    %11 = arith.maximumf %9, %10 : vector<8x8xf32>
    %c0_11 = arith.constant 0 : index
    %c0_12 = arith.constant 0 : index
    %12 = vector.load %arg6[%c0_11, %c0_12] : memref<8x8xf32, #tpu.memory_space<vmem>>, vector<8x8xf32>
    %cst_13 = arith.constant dense<0.000000e+00> : vector<8x8xf32>
    %13 = tpu.matmul %11, %12, %cst_13 {dimension_numbers = #tpu.dot_dimension_numbers<[1], [0], [0], [1], [0, 0, 1, 1], [], []>} : vector<8x8xf32>, vector<8x8xf32>, vector<8x8xf32> -> vector<8x8xf32>
    %c0_14 = arith.constant 0 : index
    %c0_15 = arith.constant 0 : index
    %14 = vector.load %arg7[%c0_14, %c0_15] : memref<15x8xf32, #tpu.memory_space<vmem>>, vector<15x8xf32>
    %cst_16 = arith.constant dense<0.000000e+00> : vector<8x8xf32>
    %15 = tpu.matmul %1, %14, %cst_16 {dimension_numbers = #tpu.dot_dimension_numbers<[1], [0], [0], [1], [0, 0, 1, 1], [], []>} : vector<8x15xf32>, vector<15x8xf32>, vector<8x8xf32> -> vector<8x8xf32>
    %16 = arith.addf %13, %15 : vector<8x8xf32>
    %c0_17 = arith.constant 0 : index
    %c0_18 = arith.constant 0 : index
    %17 = vector.load %arg8[%c0_17, %c0_18] : memref<1x8xf32, #tpu.memory_space<vmem>>, vector<1x8xf32>
    %18 = vector.broadcast %17 : vector<1x8xf32> to vector<8x8xf32>
    %19 = arith.addf %16, %18 : vector<8x8xf32>
    %cst_19 = arith.constant 0.000000e+00 : f32
    %20 = vector.broadcast %cst_19 : f32 to vector<8x8xf32>
    %21 = arith.maximumf %19, %20 : vector<8x8xf32>
    %c0_20 = arith.constant 0 : index
    %c0_21 = arith.constant 0 : index
    %22 = vector.load %arg9[%c0_20, %c0_21] : memref<8x48xf32, #tpu.memory_space<vmem>>, vector<8x48xf32>
    %cst_22 = arith.constant dense<0.000000e+00> : vector<8x48xf32>
    %23 = tpu.matmul %21, %22, %cst_22 {dimension_numbers = #tpu.dot_dimension_numbers<[1], [0], [0], [1], [0, 0, 1, 1], [], []>} : vector<8x8xf32>, vector<8x48xf32>, vector<8x48xf32> -> vector<8x48xf32>
    %c0_23 = arith.constant 0 : index
    %c0_24 = arith.constant 0 : index
    %24 = vector.load %arg10[%c0_23, %c0_24] : memref<1x48xf32, #tpu.memory_space<vmem>>, vector<1x48xf32>
    %25 = vector.broadcast %24 : vector<1x48xf32> to vector<8x48xf32>
    %26 = arith.addf %23, %25 : vector<8x48xf32>
    %c0_25 = arith.constant 0 : index
    %c0_26 = arith.constant 0 : index
    %27 = vector.load %arg11[%c0_25, %c0_26] : memref<8x48xf32, #tpu.memory_space<vmem>>, vector<8x48xf32>
    tpu.vector_store %arg11[%c0_25, %c0_26], %26 {strides = array<i32>} : memref<8x48xf32, #tpu.memory_space<vmem>>, vector<8x48xf32>,
    return
  }
  func.func @transform_0(%arg0: i32) -> (i32, i32) {
    %c0_i32 = arith.constant 0 : i32
    %c0_i32_0 = arith.constant 0 : i32
    return %arg0, %c0_i32 : i32, i32
  }
  func.func @transform_1(%arg0: i32) -> (i32, i32) {
    %c0_i32 = arith.constant 0 : i32
    %c0_i32_0 = arith.constant 0 : i32
    return %arg0, %c0_i32 : i32, i32
  }
  func.func @transform_2(%arg0: i32) -> (i32, i32) {
    %c0_i32 = arith.constant 0 : i32
    %c0_i32_0 = arith.constant 0 : i32
    %c0_i32_1 = arith.constant 0 : i32
    return %c0_i32, %c0_i32_0 : i32, i32
  }
  func.func @transform_3(%arg0: i32) -> (i32, i32) {
    %c0_i32 = arith.constant 0 : i32
    %c0_i32_0 = arith.constant 0 : i32
    %c0_i32_1 = arith.constant 0 : i32
    return %c0_i32, %c0_i32_0 : i32, i32
  }
  func.func @transform_4(%arg0: i32) -> (i32, i32) {
    %c0_i32 = arith.constant 0 : i32
    %c0_i32_0 = arith.constant 0 : i32
    %c0_i32_1 = arith.constant 0 : i32
    return %c0_i32, %c0_i32_0 : i32, i32
  }
  func.func @transform_5(%arg0: i32) -> (i32, i32) {
    %c0_i32 = arith.constant 0 : i32
    %c0_i32_0 = arith.constant 0 : i32
    %c0_i32_1 = arith.constant 0 : i32
    return %c0_i32, %c0_i32_0 : i32, i32
  }
  func.func @transform_6(%arg0: i32) -> (i32, i32) {
    %c0_i32 = arith.constant 0 : i32
    %c0_i32_0 = arith.constant 0 : i32
    %c0_i32_1 = arith.constant 0 : i32
    return %c0_i32, %c0_i32_0 : i32, i32
  }
  func.func @transform_7(%arg0: i32) -> (i32, i32) {
    %c0_i32 = arith.constant 0 : i32
    %c0_i32_0 = arith.constant 0 : i32
    %c0_i32_1 = arith.constant 0 : i32
    return %c0_i32, %c0_i32_0 : i32, i32
  }
  func.func @transform_8(%arg0: i32) -> (i32, i32) {
    %c0_i32 = arith.constant 0 : i32
    %c0_i32_0 = arith.constant 0 : i32
    %c0_i32_1 = arith.constant 0 : i32
    return %c0_i32, %c0_i32_0 : i32, i32
  }
  func.func @transform_9(%arg0: i32) -> (i32, i32) {
    %c0_i32 = arith.constant 0 : i32
    %c0_i32_0 = arith.constant 0 : i32
    %c0_i32_1 = arith.constant 0 : i32
    return %c0_i32, %c0_i32_0 : i32, i32
  }
  func.func @transform_10(%arg0: i32) -> (i32, i32) {
    %c0_i32 = arith.constant 0 : i32
    %c0_i32_0 = arith.constant 0 : i32
    return %arg0, %c0_i32 : i32, i32
  }
}

</mosaic_0001>

<bundles_post_ra>
// kernel: tpu_custom_call.1
= control target key start
LH: loop header
LB: loop body
LE: loop exit
PB: predicated region body
PF: predicated region fallthrough
CT: control target
= control target key end

     0   :  { %vm50_vm0 = vcmask 1046528   ;;  %vm46_vm1 = vcmask 121856   ;;  %s358_s0 = inlined_call_operand.vmem [shape: f32[8,48], index: 0, kind: input, shape index: {}]   ;;  %s359_s1 = inlined_call_operand.vmem [shape: f32[8,15], index: 1, kind: input, shape index: {}]   ;;  %s360_s2 = inlined_call_operand.vmem [shape: f32[48,8], index: 2, kind: input, shape index: {}]   ;;  %s361_s3 = inlined_call_operand.vmem [shape: f32[15,8], index: 3, kind: input, shape index: {}]   ;;  %s362_s4 = inlined_call_operand.vmem [shape: f32[1,8], index: 4, kind: input, shape index: {}]   ;;  %s363_s5 = inlined_call_operand.vmem [shape: f32[8,8], index: 5, kind: input, shape index: {}]   ;;  %s364_s6 = inlined_call_operand.vmem [shape: f32[15,8], index: 6, kind: input, shape index: {}]   ;;  %s365_s7 = inlined_call_operand.vmem [shape: f32[1,8], index: 7, kind: input, shape index: {}]   ;;  %s366_s8 = inlined_call_operand.vmem [shape: f32[8,48], index: 8, kind: input, shape index: {}]   ;;  %s367_s9 = inlined_call_operand.vmem [shape: f32[1,48], index: 9, kind: input, shape index: {}]   ;;  %s368_s10 = inlined_call_operand.hbm [shape: f32[8,48], index: 10, kind: output, shape index: {}]  }
   0x1   :  { %v43_v0 = vld [vmem:[%s360_s2 + $0x28] sm:$0xff]  ;;  %v42_v1 = vld [vmem:[%s360_s2 + $0x20] sm:$0xff]  ;;  %v41_v3 = vld [vmem:[%s360_s2 + $0x18] sm:$0xff] }
   0x2   :  { %88 = vmatpush.msra.mxu1 %v43_v0  ;;  %v45_v2 = vld [vmem:[%s361_s3 + $0x8] sm:$0x7f]  ;;  %v44_v4 = vld [vmem:[%s361_s3] sm:$0xff]  ;;  %v40_v6 = vld [vmem:[%s360_s2 + $0x10] sm:$0xff] }
   0x3   :  { %205 = vmatpush.msk.msra.mxu0 %vm50_vm0, %v45_v2  ;;  %v37_v5 = vld [vmem:[%s359_s1] sm:$0xff] }
   0x4   :  { %89 = vmatpush.msra.mxu1 %v42_v1 }
   0x5   :  { %69 = vmatpush.msra.mxu0 %v44_v4 }
   0x6   :  { %15 = vsyncpa [#allocation3], 0  ;;  %90 = vmatpush.msra.mxu1 %v41_v3  ;;  %206 = vmatmul.msk.f32.vlgmr.msra.gmra.mxu0 %vm46_vm1, %v37_v5  ;;  %v39_v7 = vld [vmem:[%s360_s2 + $0x8] sm:$0xff]  ;;  %v38_v8 = vld [vmem:[%s360_s2] sm:$0xff]  ;;  %vm74_vm2 = vcmask 392192   ;;  %vm130_vm3 = vcmask 64512  }
   0x7   :  { %v36_v9 = vld [vmem:[%s358_s0] sm:$0xff]  ;;  %v106_v10 = vld [vmem:[%s364_s6 + $0x8] sm:$0x7f]  ;;  %s196_s23 = sshll.u32 %s368_s10, 4  ;;  %s197_s23 = int_to_ptr.hbm [resolvable:$true] %s196_s23 }
   0x8   :  { %91 = vmatpush.msra.mxu1 %v40_v6  ;;  %208 = vmatpush.msk.msra.mxu2 %vm50_vm0, %v106_v10  ;;  %v105_v11 = vld [vmem:[%s364_s6] sm:$0xff] }
   0x9   :  { %v104_v12 = vld [vmem:[%s363_s5] sm:$0xff] }
   0xa   :  { %92 = vmatpush.msra.mxu1 %v39_v7  ;;  %125 = vmatpush.msra.mxu2 %v105_v11  ;;  %v160_v13 = vld [vmem:[%s366_s8] sm:$0xff] }
   0xb   :  { %149 = vmatpush.msra.mxu3 %v104_v12  ;;  %209 = vmatmul.msk.f32.vlgmr.msra.gmra.mxu2 %vm46_vm1, %v37_v5  ;;  %v213_v15 = vld [vmem:[%s362_s4] ss:$0 sm:$0xff]  ;;  %s242_s4 = smov [#allocation2]  }
   0xc   :  { %93 = vmatpush.msra.mxu1 %v38_v8  ;;  %v214_v21 = vld [vmem:[%s365_s7] ss:$0 sm:$0xff]  ;;  %s194_s20 = sshll.u32 %s242_s4, 4  ;;  %s195_s20 = int_to_ptr.vmem [resolvable:$true] %s194_s20 }
   0xd   :  { %207 = vmatmul.msk.f32.vlgmr.msra.gmra.mxu1 %vm74_vm2, %v36_v9  ;;  %183 = vmatpush.msrb.mxu3 %v160_v13  ;;  %v215_v26 = vld [vmem:[%s367_s9] ss:$0 sm:$0xff] }
  0x83   :  { %v71_v14 = vpop.f32.mrf.mxu0 }
  0x8a   :  { %v95_v16 = vpop.f32.mrf.mxu1 }
  0x8b   :  { %v96_v17 = vadd.f32 %v95_v16, %v71_v14 }
  0x8d   :  { %v102_v18 = vadd.f32 %v213_v15, %v96_v17 }
  0x8e   :  { %v127_v20 = vpop.f32.mrf.mxu2 }
  0x8f   :  { %v103_v19 = vmax.f32 %v102_v18, 0.0 }
  0x91   :  { %210 = vmatmul.msk.f32.vlgmr.msra.gmra.mxu3 %vm130_vm3, %v103_v19 }
 0x114   :  { %v151_v22 = vpop.f32.mrf.mxu3 }
 0x115   :  { %v152_v23 = vadd.f32 %v151_v22, %v127_v20 }
 0x117   :  { %v158_v24 = vadd.f32 %v214_v21, %v152_v23 }
 0x119   :  { %v159_v25 = vmax.f32 %v158_v24, 0.0 }
 0x11b   :  { %211 = vmatmul.msk.f32.vlgmr.msrb.gmra.mxu3 %vm130_vm3, %v159_v25 }
 0x19e   :  { %v185_v27 = vpop.f32.mrf.mxu3 }
 0x19f   :  { %v186_v28 = vadd.f32 %v215_v26, %v185_v27 }
 0x1a1   :  { %188 = vst.msk [vmem:[#allocation2] sm:$0xff] %vm74_vm2, %v186_v28 }
 0x1a2   :  { %199 = dma.vmem_to_hbm [thread:$0]  %s195_s20, 128, %s197_s23, [#allocation3]  }
 0x1a3   :  { %240 = dma.done.wait [#allocation3], 128  }
 0x1a4   :  { %241 = vsyncadd [#allocation3], 4294967168 }
 0x1a5   :  { %204 = vsyncpa [#allocation3], 1 }

</bundles_post_ra>
